<compile_context>
chip_gen: v6e
topology: v6e:2x2x1
jax: 0.10.0
libtpu: 0.0.40
codegen_flags: <defaults>
</compile_context>

<pallas_src>
import functools

import jax
import jax.numpy as jnp
from jax.experimental import pallas as pl
from jax.experimental.pallas import tpu as pltpu

HIDDEN = 256
LANE = 128


def _round_up(x, m):
    return ((x + m - 1) // m) * m


def _cdiv(a, b):
    return (a + b - 1) // b


def _choose_tiling(batch, cap=1024, min_split=512):
    """Pick (TM, B_pad): big tiles to amortize per-step overhead, >= 2 tiles for
    mid/large batches (v7x megacore sharding), minimal padded dead rows."""
    b8 = _round_up(max(batch, 1), 8)
    if b8 <= min_split:
        return b8, b8                       # single tile, pad only to a multiple of 8
    n_tiles = max(2, _cdiv(b8, cap))        # >= 2 grid steps -> both TCs busy on v7x
    tm = _round_up(_cdiv(b8, n_tiles), 8)
    return tm, n_tiles * tm


def _generator_kernel(z_ref, w1_ref, b1_ref, w2_ref, b2_ref, w3_ref, b3_ref, o_ref):
    # Layer 1: Linear(D_in, 256) + ReLU.  b1_ref already contains b1 + pref @ W1[D_in:].
    z = z_ref[...].astype(w1_ref.dtype)                       # in-kernel f32->bf16 cast
    h1 = jnp.dot(z, w1_ref[...], preferred_element_type=jnp.float32)
    h1 = jnp.maximum(h1 + b1_ref[...], 0.0)                   # f32 bias/ReLU on VPU
    # Layer 2: Linear(256, 256) + ReLU.
    h2 = jnp.dot(h1.astype(w2_ref.dtype), w2_ref[...], preferred_element_type=jnp.float32)
    h2 = jnp.maximum(h2 + b2_ref[...], 0.0)
    # Layer 3: Linear(256, out_pad) (output lane-padded to a multiple of 128).
    out = jnp.dot(h2.astype(w3_ref.dtype), w3_ref[...], preferred_element_type=jnp.float32)
    o_ref[...] = (out + b3_ref[...]).astype(o_ref.dtype)


def prepare_params(params, input_dim, compute_dtype=jnp.bfloat16):
    """One-time parameter prep: split W1 for the pref fold, cast matmul weights to the
    MXU compute dtype, and pad W3/b3 so the kernel output is lane-dense (mult of 128).
    On v7x, compute_dtype could be fp8 for w2/w3 (bf16 activations); bf16 is portable."""
    out_dim = params["w3"].shape[1]
    out_pad = _round_up(out_dim, LANE)
    w1 = params["w1"]
    assert w1.shape[0] == input_dim + 2, "W1 must have input_dim + 2 rows"
    return dict(
        w1z=w1[:input_dim].astype(compute_dtype),              # (D_in, 256)
        w1p=w1[input_dim:].astype(jnp.float32),                # (2, 256)  folded per call
        b1=params["b1"].astype(jnp.float32),                   # (1, 256)
        w2=params["w2"].astype(compute_dtype),                 # (256, 256)
        b2=params["b2"].astype(jnp.float32),                   # (1, 256)
        w3=jnp.pad(params["w3"], ((0, 0), (0, out_pad - out_dim))).astype(compute_dtype),
        b3=jnp.pad(params["b3"], ((0, 0), (0, out_pad - out_dim))).astype(jnp.float32),
    )


@functools.partial(jax.jit, static_argnames=("out_dim", "out_dtype"))
def generator_forward(z, pref, prep, *, out_dim, out_dtype=jnp.float32):
    """Forward pass.

    z:    (B, D_in) f32
    pref: (2,) for a single preference vector or (P, 2) for a batch of them.
    Returns (B, out_dim) for a single pref, (P, B, out_dim) for P prefs.
    """
    B, input_dim = z.shape
    # Robustness: prep must have been built for this input_dim, else the W1 split
    # silently mis-folds the pref rows into the z weights.
    assert prep["w1z"].shape[0] == input_dim, (
        f"prepare_params input_dim={prep['w1z'].shape[0]} != z.shape[1]={input_dim}")

    single_pref = (pref.ndim == 1)
    prefs2d = jnp.atleast_2d(pref).astype(jnp.float32)          # (P, 2)
    P = prefs2d.shape[0]
    out_pad = prep["w3"].shape[1]

    # Fold the per-pref conditioning into the layer-1 bias (tiny f32 matmul),
    # shaped (P, 1, HIDDEN) so the per-step block (1, HIDDEN) is layout-legal.
    b1_eff = (prep["b1"] + prefs2d @ prep["w1p"]).reshape(P, 1, HIDDEN)

    # Batch tiling (see _choose_tiling).
    TM, B_pad = _choose_tiling(B)
    z_in = z if B_pad == B else jnp.pad(z, ((0, B_pad - B), (0, 0)))
    n_tiles = B_pad // TM

    resident = lambda i, p: (0, 0)   # weights/biases: same block every step -> resident
    out = pl.pallas_call(
        _generator_kernel,
        out_shape=jax.ShapeDtypeStruct((P, B_pad, out_pad), out_dtype),
        grid_spec=pltpu.PrefetchScalarGridSpec(
            num_scalar_prefetch=0,
            grid=(n_tiles, P),                                   # batch outer, prefs inner
            in_specs=[
                pl.BlockSpec((TM, input_dim), lambda i, p: (i, 0)),     # z tile (f32, pipelined)
                pl.BlockSpec((input_dim, HIDDEN), resident),            # w1z
                pl.BlockSpec((None, 1, HIDDEN), lambda i, p: (p, 0, 0)),  # folded b1 (per pref)
                pl.BlockSpec((HIDDEN, HIDDEN), resident),               # w2
                pl.BlockSpec((1, HIDDEN), resident),                    # b2
                pl.BlockSpec((HIDDEN, out_pad), resident),              # w3 (lane-padded)
                pl.BlockSpec((1, out_pad), resident),                   # b3 (lane-padded)
            ],
            out_specs=pl.BlockSpec((None, TM, out_pad), lambda i, p: (p, i, 0)),
        ),
        compiler_params=pltpu.CompilerParams(
            dimension_semantics=("parallel", "parallel"),  # shards batch tiles across TCs
        ),
    )(z_in, prep["w1z"], b1_eff, prep["w2"], prep["b2"], prep["w3"], prep["b3"])

    out = out[:, :B, :out_dim]
    return out[0] if single_pref else out


def init_params(key, input_dim, output_dim, hidden=HIDDEN):
    """Deterministic synthetic init (stands in for nn.Linear's default init)."""
    ks = jax.random.split(key, 6)
    d_in = input_dim + 2

    def lin(kw, kb, fan_in, fan_out):
        bound = 1.0 / jnp.sqrt(jnp.float32(fan_in))
        w = jax.random.uniform(kw, (fan_in, fan_out), jnp.float32, -bound, bound)
        b = jax.random.uniform(kb, (1, fan_out), jnp.float32, -bound, bound)
        return w, b

    w1, b1 = lin(ks[0], ks[1], d_in, hidden)
    w2, b2 = lin(ks[2], ks[3], hidden, hidden)
    w3, b3 = lin(ks[4], ks[5], hidden, output_dim)
    return dict(w1=w1, b1=b1, w2=w2, b2=b2, w3=w3, b3=b3)


def _reference_forward_f32(z, pref, p):
    """Pure-f32 reference matching the torch module exactly (single pref)."""
    pref_batch = jnp.broadcast_to(pref[None, :], (z.shape[0], pref.shape[0]))
    x = jnp.concatenate([z, pref_batch], axis=1)
    h1 = jnp.maximum(x @ p["w1"] + p["b1"], 0.0)
    h2 = jnp.maximum(h1 @ p["w2"] + p["b2"], 0.0)
    return h2 @ p["w3"] + p["b3"]


def _reference_forward_matched(z, pref, p, compute_dtype=jnp.bfloat16):
    """Reference with the same bf16-matmul / f32-accumulate semantics as the kernel."""
    input_dim = z.shape[1]
    w1 = p["w1"]
    b1_eff = p["b1"] + pref[None, :] @ w1[input_dim:]
    dot = lambda a, b: jnp.dot(a.astype(compute_dtype), b.astype(compute_dtype),
                               preferred_element_type=jnp.float32)
    h1 = jnp.maximum(dot(z, w1[:input_dim]) + b1_eff, 0.0)
    h2 = jnp.maximum(dot(h1, p["w2"]) + p["b2"], 0.0)
    return dot(h2, p["w3"]) + p["b3"]


if __name__ == "__main__":
    key = jax.random.PRNGKey(0)
    k_param, k_z, k_pref, k_z2, k_pref2 = jax.random.split(key, 5)

    input_dim, output_dim = 32, 16
    params = init_params(k_param, input_dim, output_dim)
    prep = prepare_params(params, input_dim)

    # --- Small single-pref check (batch=8, single tile) ---------------------------
    batch = 8
    z = jax.random.normal(k_z, (batch, input_dim), jnp.float32)
    pref_raw = jax.random.uniform(k_pref, (2,), jnp.float32)
    pref = pref_raw / jnp.sum(pref_raw)            # preference vector on the simplex

    out = generator_forward(z, pref, prep, out_dim=output_dim)
    out = jax.block_until_ready(out)
    assert out.shape == (batch, output_dim)

    ref_matched = _reference_forward_matched(z, pref, params)
    assert jnp.allclose(out, ref_matched, atol=2e-3, rtol=2e-3)
    ref_f32 = _reference_forward_f32(z, pref, params)
    assert jnp.allclose(out, ref_f32, atol=1e-1, rtol=1e-1)

    # --- Larger multi-pref check (exercises batch tiling + padding + pref grid) ---
    B2, P = 600, 3
    z2 = jax.random.normal(k_z2, (B2, input_dim), jnp.float32)
    prefs_raw = jax.random.uniform(k_pref2, (P, 2), jnp.float32)
    prefs = prefs_raw / jnp.sum(prefs_raw, axis=1, keepdims=True)

    out2 = generator_forward(z2, prefs, prep, out_dim=output_dim)
    out2 = jax.block_until_ready(out2)
    assert out2.shape == (P, B2, output_dim)
    for pidx in range(P):
        ref_p = _reference_forward_matched(z2, prefs[pidx], params)
        assert jnp.allclose(out2[pidx], ref_p, atol=2e-3, rtol=2e-3)

    print("KERNEL_OK")
</pallas_src>

<mosaic_0001>
module attributes {stable_mosaic.version = 11 : i64} {
  func.func @_generator_kernel(%arg0: i32, %arg1: i32, %arg2: memref<8x32xf32, #tpu.memory_space<vmem>>, %arg3: memref<32x256xbf16, #tpu.memory_space<vmem>>, %arg4: memref<1x1x256xf32, #tpu.memory_space<vmem>>, %arg5: memref<256x256xbf16, #tpu.memory_space<vmem>>, %arg6: memref<1x256xf32, #tpu.memory_space<vmem>>, %arg7: memref<256x128xbf16, #tpu.memory_space<vmem>>, %arg8: memref<1x128xf32, #tpu.memory_space<vmem>>, %arg9: memref<1x8x128xf32, #tpu.memory_space<vmem>>) attributes {dimension_semantics = [#tpu.dimension_semantics<parallel>, #tpu.dimension_semantics<parallel>], iteration_bounds = array<i64: 1, 1>, scalar_prefetch = 0 : i64, scratch_operands = 0 : i64, tpu.core_type = #tpu.core_type<tc>, window_params = [{transform_indices = @transform_0, window_bounds = array<i64: 8, 32>}, {pipeline_mode = #tpu.pipeline_mode<synchronous>, transform_indices = @transform_1, window_bounds = array<i64: 32, 256>}, {transform_indices = @transform_2, window_bounds = array<i64: 1, 1, 256>}, {pipeline_mode = #tpu.pipeline_mode<synchronous>, transform_indices = @transform_3, window_bounds = array<i64: 256, 256>}, {pipeline_mode = #tpu.pipeline_mode<synchronous>, transform_indices = @transform_4, window_bounds = array<i64: 1, 256>}, {pipeline_mode = #tpu.pipeline_mode<synchronous>, transform_indices = @transform_5, window_bounds = array<i64: 256, 128>}, {pipeline_mode = #tpu.pipeline_mode<synchronous>, transform_indices = @transform_6, window_bounds = array<i64: 1, 128>}, {transform_indices = @transform_7, window_bounds = array<i64: 1, 8, 128>}]} {
    %c0 = arith.constant 0 : index
    %c0_0 = arith.constant 0 : index
    %0 = vector.load %arg2[%c0, %c0_0] : memref<8x32xf32, #tpu.memory_space<vmem>>, vector<8x32xf32>
    %1 = arith.truncf %0 : vector<8x32xf32> to vector<8x32xbf16>
    %c0_1 = arith.constant 0 : index
    %c0_2 = arith.constant 0 : index
    %2 = vector.load %arg3[%c0_1, %c0_2] : memref<32x256xbf16, #tpu.memory_space<vmem>>, vector<32x256xbf16>
    %cst = arith.constant dense<0.000000e+00> : vector<8x256xf32>
    %3 = tpu.matmul %1, %2, %cst {dimension_numbers = #tpu.dot_dimension_numbers<[1], [0], [0], [1], [0, 0, 1, 1], [], []>} : vector<8x32xbf16>, vector<32x256xbf16>, vector<8x256xf32> -> vector<8x256xf32>
    %c0_3 = arith.constant 0 : index
    %c0_4 = arith.constant 0 : index
    %c0_5 = arith.constant 0 : index
    %4 = vector.load %arg4[%c0_3, %c0_4, %c0_5] : memref<1x1x256xf32, #tpu.memory_space<vmem>>, vector<1x1x256xf32>
    %5 = vector.shape_cast %4 : vector<1x1x256xf32> to vector<1x256xf32>
    %6 = vector.broadcast %5 : vector<1x256xf32> to vector<8x256xf32>
    %7 = arith.addf %3, %6 : vector<8x256xf32>
    %cst_6 = arith.constant 0.000000e+00 : f32
    %8 = vector.broadcast %cst_6 : f32 to vector<8x256xf32>
    %9 = arith.maximumf %7, %8 : vector<8x256xf32>
    %10 = arith.truncf %9 : vector<8x256xf32> to vector<8x256xbf16>
    %c0_7 = arith.constant 0 : index
    %c0_8 = arith.constant 0 : index
    %11 = vector.load %arg5[%c0_7, %c0_8] : memref<256x256xbf16, #tpu.memory_space<vmem>>, vector<256x256xbf16>
    %cst_9 = arith.constant dense<0.000000e+00> : vector<8x256xf32>
    %12 = tpu.matmul %10, %11, %cst_9 {dimension_numbers = #tpu.dot_dimension_numbers<[1], [0], [0], [1], [0, 0, 1, 1], [], []>} : vector<8x256xbf16>, vector<256x256xbf16>, vector<8x256xf32> -> vector<8x256xf32>
    %c0_10 = arith.constant 0 : index
    %c0_11 = arith.constant 0 : index
    %13 = vector.load %arg6[%c0_10, %c0_11] : memref<1x256xf32, #tpu.memory_space<vmem>>, vector<1x256xf32>
    %14 = vector.broadcast %13 : vector<1x256xf32> to vector<8x256xf32>
    %15 = arith.addf %12, %14 : vector<8x256xf32>
    %cst_12 = arith.constant 0.000000e+00 : f32
    %16 = vector.broadcast %cst_12 : f32 to vector<8x256xf32>
    %17 = arith.maximumf %15, %16 : vector<8x256xf32>
    %18 = arith.truncf %17 : vector<8x256xf32> to vector<8x256xbf16>
    %c0_13 = arith.constant 0 : index
    %c0_14 = arith.constant 0 : index
    %19 = vector.load %arg7[%c0_13, %c0_14] : memref<256x128xbf16, #tpu.memory_space<vmem>>, vector<256x128xbf16>
    %cst_15 = arith.constant dense<0.000000e+00> : vector<8x128xf32>
    %20 = tpu.matmul %18, %19, %cst_15 {dimension_numbers = #tpu.dot_dimension_numbers<[1], [0], [0], [1], [0, 0, 1, 1], [], []>} : vector<8x256xbf16>, vector<256x128xbf16>, vector<8x128xf32> -> vector<8x128xf32>
    %c0_16 = arith.constant 0 : index
    %c0_17 = arith.constant 0 : index
    %21 = vector.load %arg8[%c0_16, %c0_17] : memref<1x128xf32, #tpu.memory_space<vmem>>, vector<1x128xf32>
    %22 = vector.broadcast %21 : vector<1x128xf32> to vector<8x128xf32>
    %23 = arith.addf %20, %22 : vector<8x128xf32>
    %c0_18 = arith.constant 0 : index
    %c0_19 = arith.constant 0 : index
    %c0_20 = arith.constant 0 : index
    %24 = vector.load %arg9[%c0_18, %c0_19, %c0_20] : memref<1x8x128xf32, #tpu.memory_space<vmem>>, vector<1x8x128xf32>
    %25 = vector.shape_cast %24 : vector<1x8x128xf32> to vector<8x128xf32>
    %26 = vector.shape_cast %23 : vector<8x128xf32> to vector<1x8x128xf32>
    tpu.vector_store %arg9[%c0_18, %c0_19, %c0_20], %26 {strides = array<i32>} : memref<1x8x128xf32, #tpu.memory_space<vmem>>, vector<1x8x128xf32>,
    return
  }
  func.func @transform_0(%arg0: i32, %arg1: i32) -> (i32, i32) {
    %c0_i32 = arith.constant 0 : i32
    %c0_i32_0 = arith.constant 0 : i32
    return %arg0, %c0_i32 : i32, i32
  }
  func.func @transform_1(%arg0: i32, %arg1: i32) -> (i32, i32) {
    %c0_i32 = arith.constant 0 : i32
    %c0_i32_0 = arith.constant 0 : i32
    %c0_i32_1 = arith.constant 0 : i32
    return %c0_i32, %c0_i32_0 : i32, i32
  }
  func.func @transform_2(%arg0: i32, %arg1: i32) -> (i32, i32, i32) {
    %c0_i32 = arith.constant 0 : i32
    %c0_i32_0 = arith.constant 0 : i32
    %c0_i32_1 = arith.constant 0 : i32
    return %arg1, %c0_i32, %c0_i32_0 : i32, i32, i32
  }
  func.func @transform_3(%arg0: i32, %arg1: i32) -> (i32, i32) {
    %c0_i32 = arith.constant 0 : i32
    %c0_i32_0 = arith.constant 0 : i32
    %c0_i32_1 = arith.constant 0 : i32
    return %c0_i32, %c0_i32_0 : i32, i32
  }
  func.func @transform_4(%arg0: i32, %arg1: i32) -> (i32, i32) {
    %c0_i32 = arith.constant 0 : i32
    %c0_i32_0 = arith.constant 0 : i32
    %c0_i32_1 = arith.constant 0 : i32
    return %c0_i32, %c0_i32_0 : i32, i32
  }
  func.func @transform_5(%arg0: i32, %arg1: i32) -> (i32, i32) {
    %c0_i32 = arith.constant 0 : i32
    %c0_i32_0 = arith.constant 0 : i32
    %c0_i32_1 = arith.constant 0 : i32
    return %c0_i32, %c0_i32_0 : i32, i32
  }
  func.func @transform_6(%arg0: i32, %arg1: i32) -> (i32, i32) {
    %c0_i32 = arith.constant 0 : i32
    %c0_i32_0 = arith.constant 0 : i32
    %c0_i32_1 = arith.constant 0 : i32
    return %c0_i32, %c0_i32_0 : i32, i32
  }
  func.func @transform_7(%arg0: i32, %arg1: i32) -> (i32, i32, i32) {
    %c0_i32 = arith.constant 0 : i32
    %c0_i32_0 = arith.constant 0 : i32
    return %arg1, %arg0, %c0_i32 : i32, i32, i32
  }
}

</mosaic_0001>

<bundles_post_ra>
// kernel: generator_forward.1
= control target key start
LH: loop header
LB: loop body
LE: loop exit
PB: predicated region body
PF: predicated region fallthrough
CT: control target
= control target key end

     0   :  { %12 = vsyncpa [#allocation3], 0  ;;  %s876_s0 = inlined_call_operand.vmem [shape: f32[8,32], index: 0, kind: input, shape index: {}]   ;;  %s877_s1 = inlined_call_operand.hbm [shape: bf16[32,256], index: 1, kind: input, shape index: {}]   ;;  %s878_s2 = inlined_call_operand.vmem [shape: f32[1,1,256], index: 2, kind: input, shape index: {}]   ;;  %s879_s3 = inlined_call_operand.hbm [shape: bf16[256,256], index: 3, kind: input, shape index: {}]   ;;  %s880_s4 = inlined_call_operand.vmem [shape: f32[1,256], index: 4, kind: input, shape index: {}]   ;;  %s881_s5 = inlined_call_operand.hbm [shape: bf16[256,128], index: 5, kind: input, shape index: {}]   ;;  %s882_s6 = inlined_call_operand.vmem [shape: f32[1,128], index: 6, kind: input, shape index: {}]   ;;  %s883_s7 = inlined_call_operand.vmem [shape: f32[1,8,128], index: 7, kind: output, shape index: {}]  }
   0x1   :  { %13 = vsyncpa [#allocation5], 0  ;;  %s804_s24 = smov [#allocation4]   ;;  %s805_s26 = smov [#allocation2]  }
   0x2   :  { %s35_s25 = sshll.u32 %s804_s24, 4  ;;  %s21_s27 = sshll.u32 %s805_s26, 4  ;;  %s36_s25 = int_to_ptr.vmem [resolvable:$true] %s35_s25  ;;  %s22_s27 = int_to_ptr.vmem [resolvable:$true] %s21_s27 }
   0x3   :  { %s748_s28 = scalar_lea.vmem %s36_s25, 4096  ;;  %p753_p1 = scmp.lt.s32.totalorder %s36_s25, %s36_s25 }
   0x4   :  { %p749_p0 = scmp.ne.s32.totalorder %s36_s25, %s748_s28  ;;  %p754_p2 = scmp.lt.s32.totalorder %s748_s28, %s748_s28 }
   0x6   :  { %p755_p3 = por %p754_p2, %p753_p1 }
   0x8   :  { %p756_p4 = pnand %p755_p3, %p749_p0 }
   0xa   :  { %759 = shalt.err (!%p756_p4)
}
   0xb   :  { %s806_s29 = smov 128   ;;  %s807_s30 = smov 8  }
   0xc   :  { %41 = dma.hbm_to_vmem [thread:$0]  %s879_s3, 4096, %s36_s25, [#allocation5], %s806_s29, %s806_s29, %s807_s30  }
   0xd   :  { %s768_s10 = scalar_lea.vmem %s22_s27, 512  ;;  %p773_p6 = scmp.lt.s32.totalorder %s22_s27, %s22_s27 }
   0xe   :  { %p769_p5 = scmp.ne.s32.totalorder %s22_s27, %s768_s10  ;;  %p774_p7 = scmp.lt.s32.totalorder %s768_s10, %s768_s10 }
  0x10   :  { %p775_p8 = por %p774_p7, %p773_p6 }
  0x12   :  { %p776_p9 = pnand %p775_p8, %p769_p5 }
  0x14   :  { %779 = shalt.err (!%p776_p9)
}
  0x15   :  { %27 = dma.hbm_to_vmem [thread:$0]  %s877_s1, 512, %s22_s27, [#allocation3], %s806_s29, %s806_s29, %s807_s30  }
  0x16   :  { %s808_s13 = smov [#allocation6]  }
  0x17   :  { %s49_s14 = sshll.u32 %s808_s13, 4  ;;  %s50_s14 = int_to_ptr.vmem [resolvable:$true] %s49_s14 }
  0x18   :  { %s788_s15 = scalar_lea.vmem %s50_s14, 2048  ;;  %p793_p11 = scmp.lt.s32.totalorder %s50_s14, %s50_s14 }
  0x19   :  { %p789_p10 = scmp.ne.s32.totalorder %s50_s14, %s788_s15  ;;  %p794_p12 = scmp.lt.s32.totalorder %s788_s15, %s788_s15 }
  0x1b   :  { %p795_p13 = por %p794_p12, %p793_p11 }
  0x1d   :  { %p796_p0 = pnand %p795_p13, %p789_p10 }
  0x1f   :  { %799 = shalt.err (!%p796_p0)
}
  0x20   :  { %s809_s3 = smov 64   ;;  %s810_s16 = smov 4  }
  0x21   :  { %55 = dma.hbm_to_vmem [thread:$0]  %s881_s5, 2048, %s50_s14, [#allocation5], %s809_s3, %s809_s3, %s810_s16  }
  0x22   :  { %800 = dma.done.wait [#allocation3], 512  }
  0x23   :  { %801 = vsyncadd [#allocation3], 4294966784 }
  0x24   :  { %802 = dma.done.wait [#allocation5], 6144  }
  0x25   :  { %803 = vsyncadd [#allocation5], 4294961152  ;;  %v811_v0 = vmov 0   ;;  %v670_v1 = vld [vmem:[#allocation2 + $0x14] ss:$8 sps:$4 sm:$0xff]   ;;  %v68_v5 = vld [vmem:[%s876_s0] sm:$0xff]  ;;  %v76_v51 = vlaneseq }
  0x26   :  { %142 = vmatprep.mubr.bf16.mxu0 %v811_v0  ;;  %v672_v2 = vld [vmem:[#allocation2 + $0x10] ss:$8 sps:$4 sm:$0xff]   ;;  %122 = vmatprep.subr.bf16.mxu0 %v670_v1  ;;  %v673_v3 = vld [vmem:[#allocation2 + $0x4] ss:$8 sps:$4 sm:$0xff]   ;;  %v675_v4 = vld [vmem:[#allocation2] ss:$8 sps:$4 sm:$0xff]   ;;  %v69_v9 = vpack.c.bf16 %v68_v5, %v68_v5 }
  0x27   :  { %123 = vmatpush1.bf16.msra.mxu0 %v672_v2  ;;  %v676_v6 = vld [vmem:[#allocation4 + $0x74] ss:$8 sps:$4 sm:$0xff]   ;;  %v678_v7 = vld [vmem:[#allocation4 + $0x70] ss:$8 sps:$4 sm:$0xff]   ;;  %v679_v8 = vld [vmem:[#allocation4 + $0x64] ss:$8 sps:$4 sm:$0xff]  }
  0x28   :  { %124 = vmatprep.subr.bf16.mxu0 %v673_v3  ;;  %359 = vmatprep.subr.bf16.mxu1 %v676_v6  ;;  %v681_v10 = vld [vmem:[#allocation4 + $0x60] ss:$8 sps:$4 sm:$0xff]   ;;  %vm106_vm0 = vcmask 261120   ;;  %v682_v11 = vld [vmem:[#allocation4 + $0x54] ss:$8 sps:$4 sm:$0xff]   ;;  %v77_v52 = vshrl.u32 %v76_v51, 7 }
  0x29   :  { %360 = vmatpush1.bf16.msra.mxu1 %v678_v7  ;;  %v684_v12 = vld [vmem:[#allocation4 + $0x50] ss:$8 sps:$4 sm:$0xff]   ;;  %v685_v13 = vld [vmem:[#allocation4 + $0x44] ss:$8 sps:$4 sm:$0xff]   ;;  %v687_v14 = vld [vmem:[#allocation4 + $0x40] ss:$8 sps:$4 sm:$0xff]  }
  0x2a   :  { %361 = vmatprep.subr.bf16.mxu1 %v679_v8  ;;  %v688_v15 = vld [vmem:[#allocation4 + $0x34] ss:$8 sps:$4 sm:$0xff]   ;;  %v690_v16 = vld [vmem:[#allocation4 + $0x30] ss:$8 sps:$4 sm:$0xff]   ;;  %v691_v17 = vld [vmem:[#allocation4 + $0x24] ss:$8 sps:$4 sm:$0xff]  }
  0x2b   :  { %125 = vmatpush1.bf16.msra.mxu0 %v675_v4  ;;  %v693_v18 = vld [vmem:[#allocation4 + $0x20] ss:$8 sps:$4 sm:$0xff]   ;;  %v694_v19 = vld [vmem:[#allocation4 + $0x14] ss:$8 sps:$4 sm:$0xff]   ;;  %v696_v20 = vld [vmem:[#allocation4 + $0x10] ss:$8 sps:$4 sm:$0xff]  }
  0x2c   :  { %v697_v21 = vld [vmem:[#allocation4 + $0x4] ss:$8 sps:$4 sm:$0xff]   ;;  %v699_v22 = vld [vmem:[#allocation4] ss:$8 sps:$4 sm:$0xff]   ;;  %v700_v23 = vld [vmem:[#allocation4 + $0xf4] ss:$8 sps:$4 sm:$0xff]  }
  0x2d   :  { %362 = vmatpush1.bf16.msra.mxu1 %v681_v10  ;;  %v702_v24 = vld [vmem:[#allocation4 + $0xf0] ss:$8 sps:$4 sm:$0xff]   ;;  %v703_v25 = vld [vmem:[#allocation4 + $0xe4] ss:$8 sps:$4 sm:$0xff]   ;;  %v705_v26 = vld [vmem:[#allocation4 + $0xe0] ss:$8 sps:$4 sm:$0xff]  }
  0x2e   :  { %590 = vmatmul.mubr.msk.bf16.vlgmr.msra.gmra.mxu0 %vm106_vm0, %v69_v9  ;;  %363 = vmatprep.subr.bf16.mxu1 %v682_v11  ;;  %v706_v27 = vld [vmem:[#allocation4 + $0xd4] ss:$8 sps:$4 sm:$0xff]   ;;  %v708_v28 = vld [vmem:[#allocation4 + $0xd0] ss:$8 sps:$4 sm:$0xff]   ;;  %v709_v29 = vld [vmem:[#allocation4 + $0xc4] ss:$8 sps:$4 sm:$0xff]  }
  0x2f   :  { %v711_v30 = vld [vmem:[#allocation4 + $0xc0] ss:$8 sps:$4 sm:$0xff]   ;;  %v712_v31 = vld [vmem:[#allocation4 + $0xb4] ss:$8 sps:$4 sm:$0xff]   ;;  %v714_v32 = vld [vmem:[#allocation4 + $0xb0] ss:$8 sps:$4 sm:$0xff]  }
  0x30   :  { %v715_v33 = vld [vmem:[#allocation4 + $0xa4] ss:$8 sps:$4 sm:$0xff]   ;;  %v717_v34 = vld [vmem:[#allocation4 + $0xa0] ss:$8 sps:$4 sm:$0xff]   ;;  %v718_v35 = vld [vmem:[#allocation4 + $0x94] ss:$8 sps:$4 sm:$0xff]  }
  0x31   :  { %364 = vmatpush1.bf16.msra.mxu1 %v684_v12  ;;  %v720_v36 = vld [vmem:[#allocation4 + $0x90] ss:$8 sps:$4 sm:$0xff]   ;;  %v721_v37 = vld [vmem:[#allocation4 + $0x84] ss:$8 sps:$4 sm:$0xff]   ;;  %v723_v38 = vld [vmem:[#allocation4 + $0x80] ss:$8 sps:$4 sm:$0xff]  }
  0x32   :  { %365 = vmatprep.subr.bf16.mxu1 %v685_v13  ;;  %v724_v39 = vld [vmem:[#allocation6 + $0x78] sm:$0xff]   ;;  %v726_v41 = vld [vmem:[#allocation6 + $0x70] sm:$0xff]   ;;  %v728_v43 = vld [vmem:[#allocation6 + $0x68] sm:$0xff]   ;;  %v78_v53 = vsub.s32 0, %v77_v52  ;;  %v82_v55 = vsub.s32 1, %v77_v52 }
  0x33   :  { %v725_v40 = vld [vmem:[#allocation6 + $0x38] sm:$0xff]   ;;  %640 = vmatprep.subr.bf16.mxu0 %v724_v39  ;;  %v727_v42 = vld [vmem:[#allocation6 + $0x30] sm:$0xff]   ;;  %v729_v44 = vld [vmem:[#allocation6 + $0x28] sm:$0xff]  }
  0x34   :  { %641 = vmatpush3.bf16.msra.mxu0 %v725_v40  ;;  %v730_v45 = vld [vmem:[#allocation6 + $0x60] sm:$0xff]   ;;  %v732_v47 = vld [vmem:[#allocation6 + $0x58] sm:$0xff]   ;;  %v734_v49 = vld [vmem:[#allocation6 + $0x50] sm:$0xff]  }
  0x35   :  { %366 = vmatpush1.bf16.msra.mxu1 %v687_v14  ;;  %642 = vmatprep.subr.bf16.mxu0 %v726_v41  ;;  %v731_v46 = vld [vmem:[#allocation6 + $0x20] sm:$0xff]   ;;  %v733_v48 = vld [vmem:[#allocation6 + $0x18] sm:$0xff]   ;;  %v735_v50 = vld [vmem:[#allocation6 + $0x10] sm:$0xff]  }
  0x36   :  { %367 = vmatprep.subr.bf16.mxu1 %v688_v15  ;;  %v74_v54 = vld [vmem:[%s878_s2] sm:$0x3]  ;;  %v736_v4 = vld [vmem:[#allocation6 + $0x48] sm:$0xff]  }
  0x37   :  { %v79_v56 = vrot.slane %v74_v54, %v78_v53  ;;  %v83_v57 = vrot.slane %v74_v54, %v82_v55  ;;  %v737_v5 = vld [vmem:[#allocation6 + $0x8] sm:$0xff]   ;;  %v738_v6 = vld [vmem:[#allocation6 + $0x40] sm:$0xff]  }
  0x38   :  { %643 = vmatpush3.bf16.msra.mxu0 %v727_v42  ;;  %v739_v7 = vld [vmem:[#allocation6] sm:$0xff]  }
  0x39   :  { %368 = vmatpush1.bf16.msra.mxu1 %v690_v16  ;;  %644 = vmatprep.subr.bf16.mxu0 %v728_v43  ;;  %v187_v8 = vld [vmem:[%s880_s4] sm:$0x3] }
  0x3a   :  { %369 = vmatprep.subr.bf16.mxu1 %v691_v17  ;;  %v192_v9 = vrot.slane %v187_v8, %v78_v53  ;;  %v196_v10 = vrot.slane %v187_v8, %v82_v55 }
  0x3c   :  { %645 = vmatpush3.bf16.msra.mxu0 %v729_v44 }
  0x3d   :  { %370 = vmatpush1.bf16.msra.mxu1 %v693_v18  ;;  %646 = vmatprep.subr.bf16.mxu0 %v730_v45 }
  0x3e   :  { %371 = vmatprep.subr.bf16.mxu1 %v694_v19 }
  0x40   :  { %647 = vmatpush3.bf16.msra.mxu0 %v731_v46 }
  0x41   :  { %372 = vmatpush1.bf16.msra.mxu1 %v696_v20  ;;  %648 = vmatprep.subr.bf16.mxu0 %v732_v47 }
  0x42   :  { %373 = vmatprep.subr.bf16.mxu1 %v697_v21 }
  0x44   :  { %649 = vmatpush3.bf16.msra.mxu0 %v733_v48 }
  0x45   :  { %374 = vmatpush1.bf16.msra.mxu1 %v699_v22  ;;  %650 = vmatprep.subr.bf16.mxu0 %v734_v49  ;;  %v623_v22 = vld [vmem:[%s882_s6] ss:$0 sm:$0xff] }
  0x46   :  { %375 = vmatprep.subr.bf16.mxu1 %v700_v23 }
  0x48   :  { %651 = vmatpush3.bf16.msra.mxu0 %v735_v50 }
  0x49   :  { %376 = vmatpush2.bf16.msra.mxu1 %v702_v24  ;;  %652 = vmatprep.subr.bf16.mxu0 %v736_v4 }
  0x4a   :  { %377 = vmatprep.subr.bf16.mxu1 %v703_v25 }
  0x4c   :  { %653 = vmatpush3.bf16.msra.mxu0 %v737_v5 }
  0x4d   :  { %378 = vmatpush2.bf16.msra.mxu1 %v705_v26  ;;  %654 = vmatprep.subr.bf16.mxu0 %v738_v6 }
  0x4e   :  { %379 = vmatprep.subr.bf16.mxu1 %v706_v27 }
  0x50   :  { %655 = vmatpush3.bf16.msra.mxu0 %v739_v7 }
  0x51   :  { %380 = vmatpush2.bf16.msra.mxu1 %v708_v28 }
  0x52   :  { %381 = vmatprep.subr.bf16.mxu1 %v709_v29 }
  0x55   :  { %382 = vmatpush2.bf16.msra.mxu1 %v711_v30 }
  0x56   :  { %383 = vmatprep.subr.bf16.mxu1 %v712_v31 }
  0x59   :  { %384 = vmatpush2.bf16.msra.mxu1 %v714_v32 }
  0x5a   :  { %385 = vmatprep.subr.bf16.mxu1 %v715_v33 }
  0x5d   :  { %386 = vmatpush2.bf16.msra.mxu1 %v717_v34 }
  0x5e   :  { %387 = vmatprep.subr.bf16.mxu1 %v718_v35 }
  0x61   :  { %388 = vmatpush2.bf16.msra.mxu1 %v720_v36 }
  0x62   :  { %389 = vmatprep.subr.bf16.mxu1 %v721_v37 }
  0x65   :  { %390 = vmatpush2.bf16.msra.mxu1 %v723_v38 }
  0xee   :  { %v144_v58 = vpop.f32.mrf.mxu0 }
  0xef   :  { %v145_v59 = vadd.f32 %v144_v58, %v79_v56 }
  0xf0   :  { %v146_v60 = vpop.f32.mrf.mxu0 }
  0xf1   :  { %v147_v61 = vadd.f32 %v146_v60, %v83_v57  ;;  %v151_v62 = vmax.f32 %v145_v59, 0.0 }
  0xf2   :  { %v148_v63 = vpop.f32.mrf.mxu0 }
  0xf3   :  { %v152_v0 = vmax.f32 %v147_v61, 0.0  ;;  %v153_v3 = vpack.c.bf16 %v151_v62, %v151_v62 }
  0xf4   :  { %v149_v1 = vpop.f32.mrf.mxu0 }
  0xf5   :  { %v154_v2 = vpack.c.bf16 %v152_v0, %v152_v0 }
  0xf7   :  { %391 = vmatprep.mubr.bf16.mxu1 %v154_v2 }
  0xf8   :  { %392 = vmatmul.mubr.bf16.vlgmr.msra.gmra.mxu1 %v153_v3 }
 0x1b8   :  { %v393_v11 = vpop.f32.mrf.mxu1 }
 0x1b9   :  { %v394_v12 = vadd.f32 %v393_v11, %v192_v9 }
 0x1ba   :  { %v395_v13 = vpop.f32.mrf.mxu1 }
 0x1bb   :  { %v396_v14 = vadd.f32 %v395_v13, %v196_v10  ;;  %v400_v15 = vmax.f32 %v394_v12, 0.0 }
 0x1bc   :  { %v397_v16 = vpop.f32.mrf.mxu1 }
 0x1bd   :  { %v401_v17 = vmax.f32 %v396_v14, 0.0  ;;  %v402_v20 = vpack.c.bf16 %v400_v15, %v400_v15 }
 0x1be   :  { %v398_v18 = vpop.f32.mrf.mxu1 }
 0x1bf   :  { %v403_v19 = vpack.c.bf16 %v401_v17, %v401_v17 }
 0x1c1   :  { %571 = vmatprep.mubr.bf16.mxu0 %v403_v19 }
 0x1c2   :  { %572 = vmatmul.mubr.bf16.vlgmr.msra.gmra.mxu0 %v402_v20 }
 0x282   :  { %v656_v21 = vpop.f32.mrf.mxu0 }
 0x284   :  { %v657_v23 = vpop.f32.mrf.mxu0 }
 0x285   :  { %v658_v24 = vadd.f32 %v657_v23, %v656_v21 }
 0x286   :  { %v659_v25 = vpop.f32.mrf.mxu0 }
 0x287   :  { %v574_v26 = vadd.f32 %v658_v24, %v623_v22 }
 0x288   :  { %v660_v27 = vpop.f32.mrf.mxu0 }
 0x289   :  { %579 = vst [vmem:[%s883_s7] sm:$0xff] %v574_v26 }
 0x28a   :  { %584 = vsyncpa [#allocation3], 1 }
 0x28b   :  { %585 = vsyncpa [#allocation5], 1 }

</bundles_post_ra>
